<compile_context>
chip_gen: v7x
topology: tpu7x:2x2x1
jax: 0.10.0
libtpu: 0.0.40
codegen_flags: <defaults>
</compile_context>

<pallas_src>
import functools

import jax
import jax.numpy as jnp
from jax import lax
from jax.experimental import pallas as pl
from jax.experimental.pallas import tpu as pltpu

_LANES = 128


def _min_sublanes(dtype) -> int:
    # f32 -> 8, bf16/f16 -> 16, int8/fp8 -> 32
    return {4: 8, 2: 16, 1: 32}.get(jnp.dtype(dtype).itemsize, 8)


def _disc_loss_kernel(real_ref, fake_ref, o_ref, acc_ref, *,
                      inv_n: float, n_valid: int, tile_rows: int, mask_tail: bool):
    i = pl.program_id(0)
    nsteps = pl.num_programs(0)

    @pl.when(i == 0)
    def _init():
        acc_ref[...] = jnp.zeros_like(acc_ref)

    r = real_ref[...].astype(jnp.float32)  # (tile_rows, 128)
    f = fake_ref[...].astype(jnp.float32)
    # Stable BCEWithLogits:
    #   label 1 (real): softplus(-r) = max(-r, 0) + log1p(exp(-|r|))
    #   label 0 (fake): softplus(+f) = max( f, 0) + log1p(exp(-|f|))
    loss = (jnp.maximum(-r, 0.0) + jnp.log1p(jnp.exp(-jnp.abs(r)))
            + jnp.maximum(f, 0.0) + jnp.log1p(jnp.exp(-jnp.abs(f))))

    def partial_sum(v):
        # Lane/sublane-shaped partial sum: pure VPU vreg adds, no cross-lane XLU work.
        if tile_rows % 8 == 0:
            return v.reshape(tile_rows // 8, 8, _LANES).sum(axis=0)   # (8, 128)
        return jnp.sum(v, axis=0, keepdims=True)                      # (1, 128) (tiny single-tile case)

    if mask_tail:
        is_last = i == nsteps - 1

        @pl.when(jnp.logical_not(is_last))
        def _full_tile():
            acc_ref[...] += partial_sum(loss)

        @pl.when(is_last)
        def _tail_tile():
            # Mask off zero-padded elements and Pallas block-padding rows.
            row = lax.broadcasted_iota(jnp.int32, (tile_rows, _LANES), 0)
            lane = lax.broadcasted_iota(jnp.int32, (tile_rows, _LANES), 1)
            gidx = (i * tile_rows + row) * _LANES + lane
            acc_ref[...] += partial_sum(jnp.where(gidx < n_valid, loss, 0.0))
    else:
        acc_ref[...] += partial_sum(loss)

    @pl.when(i == nsteps - 1)
    def _finalize():
        # Single cross-lane/sublane reduce + single divide by the true N.
        o_ref[...] = jnp.reshape(jnp.sum(acc_ref[...]) * inv_n, (1, 1))


def _squeeze_dim1(x):
    # torch.squeeze(x, dim=1): drops dim 1 only if it has size 1.
    if x.ndim >= 2 and x.shape[1] == 1:
        return jnp.squeeze(x, axis=1)
    return x


def discriminator_loss(real_output, fake_output, *, max_tile_rows: int = 4096):
    """Pallas equivalent of DiscriminatorLoss.forward. Returns a scalar f32 loss."""
    real = jnp.reshape(_squeeze_dim1(real_output), (-1,))
    fake = jnp.reshape(_squeeze_dim1(fake_output), (-1,))
    n = real.shape[0]
    assert fake.shape[0] == n, "real/fake batch sizes must match"

    rows = pl.cdiv(n, _LANES)         # minimal lane-dense row count (no tile round-up)
    n_lane_pad = rows * _LANES

    def to_lane_dense(x):
        if n_lane_pad != n:
            x = jnp.pad(x, (0, n_lane_pad - n))   # minimal pad; zero-copy when N % 128 == 0
        return x.reshape(rows, _LANES)

    real2d = to_lane_dense(real)
    fake2d = to_lane_dense(fake)

    # Dtype-aware row granularity (full vreg packing for sub-32-bit dtypes).
    gran = max(_min_sublanes(real2d.dtype), _min_sublanes(fake2d.dtype))
    tile_rows_cap = max(gran, (max_tile_rows // gran) * gran)
    # Single block (block dim == full dim, always legal) when everything fits in one tile.
    tile_rows = rows if rows <= tile_rows_cap else tile_rows_cap

    num_tiles = pl.cdiv(rows, tile_rows)
    covered = num_tiles * tile_rows * _LANES
    mask_tail = covered != n           # zero-padding and/or partial last block present

    acc_rows = 8 if tile_rows % 8 == 0 else 1

    out = pl.pallas_call(
        functools.partial(_disc_loss_kernel, inv_n=1.0 / n, n_valid=n,
                          tile_rows=tile_rows, mask_tail=mask_tail),
        out_shape=jax.ShapeDtypeStruct((1, 1), jnp.float32),
        grid=(num_tiles,),
        in_specs=[pl.BlockSpec((tile_rows, _LANES), lambda i: (i, 0)),
                  pl.BlockSpec((tile_rows, _LANES), lambda i: (i, 0))],
        out_specs=pl.BlockSpec((1, 1), lambda i: (0, 0)),
        scratch_shapes=[pltpu.VMEM((acc_rows, _LANES), jnp.float32)],
        compiler_params=pltpu.CompilerParams(
            dimension_semantics=("arbitrary",)),
    )(real2d, fake2d)
    return out[0, 0]


def _reference_loss(real_output, fake_output):
    """Plain-JAX reference mirroring nn.BCEWithLogitsLoss (mean reduction) semantics."""
    r = jnp.reshape(_squeeze_dim1(real_output), (-1,)).astype(jnp.float32)
    f = jnp.reshape(_squeeze_dim1(fake_output), (-1,)).astype(jnp.float32)
    loss_t = jnp.mean(jnp.maximum(r, 0.0) - r + jnp.log1p(jnp.exp(-jnp.abs(r))))
    loss_f = jnp.mean(jnp.maximum(f, 0.0) + jnp.log1p(jnp.exp(-jnp.abs(f))))
    return loss_t + loss_f


if __name__ == "__main__":
    key = jax.random.PRNGKey(0)
    k1, k2, k3, k4, k5, k6 = jax.random.split(key, 6)

    # 1) Module-shaped inputs (N, 1), f32, N = 8 (single tiny tile + tail mask).
    N = 8
    real_output = jax.random.normal(k1, (N, 1), dtype=jnp.float32)
    fake_output = jax.random.normal(k2, (N, 1), dtype=jnp.float32)
    loss = jax.block_until_ready(discriminator_loss(real_output, fake_output))
    ref = jax.block_until_ready(_reference_loss(real_output, fake_output))
    assert jnp.allclose(loss, ref, atol=1e-5, rtol=1e-5), (loss, ref)

    # 2) bf16 inputs, N not a multiple of 128, small tile cap so the multi-step
    #    accumulation path + in-kernel tail mask + partial-last-block path all run.
    N2 = 2500
    real2 = jax.random.normal(k3, (N2, 1), dtype=jnp.bfloat16)
    fake2 = jax.random.normal(k4, (N2, 1), dtype=jnp.bfloat16)
    loss2 = jax.block_until_ready(discriminator_loss(real2, fake2, max_tile_rows=16))
    ref2 = jax.block_until_ready(_reference_loss(real2, fake2))
    assert jnp.allclose(loss2, ref2, atol=1e-4, rtol=1e-4), (loss2, ref2)

    # 3) f32 inputs with N a multiple of 128 (zero-copy reshape, no tail mask path).
    N3 = 4096
    real3 = jax.random.normal(k5, (N3, 1), dtype=jnp.float32)
    fake3 = jax.random.normal(k6, (N3, 1), dtype=jnp.float32)
    loss3 = jax.block_until_ready(discriminator_loss(real3, fake3))
    ref3 = jax.block_until_ready(_reference_loss(real3, fake3))
    assert jnp.allclose(loss3, ref3, atol=1e-5, rtol=1e-5), (loss3, ref3)

    print("KERNEL_OK")
</pallas_src>

<mosaic_0001>
module attributes {stable_mosaic.version = 11 : i64} {
  func.func @_disc_loss_kernel(%arg0: i32, %arg1: memref<1x128xf32, #tpu.memory_space<vmem>>, %arg2: memref<1x128xf32, #tpu.memory_space<vmem>>, %arg3: memref<1x1xf32, #tpu.memory_space<vmem>>, %arg4: memref<1x128xf32, #tpu.memory_space<vmem>>) attributes {dimension_semantics = [#tpu.dimension_semantics<arbitrary>], iteration_bounds = array<i64: 1>, scalar_prefetch = 0 : i64, scratch_operands = 1 : i64, tpu.core_type = #tpu.core_type<tc>, window_params = [{transform_indices = @transform_0, window_bounds = array<i64: 1, 128>}, {transform_indices = @transform_1, window_bounds = array<i64: 1, 128>}, {pipeline_mode = #tpu.pipeline_mode<synchronous>, transform_indices = @transform_2, window_bounds = array<i64: 1, 1>}]} {
    %c0_i32 = arith.constant 0 : i32
    %0 = arith.cmpi eq, %arg0, %c0_i32 : i32
    %1 = arith.extui %0 : i1 to i32
    %c0_i32_0 = arith.constant 0 : i32
    %2 = arith.cmpi ne, %1, %c0_i32_0 : i32
    scf.if %2 {
      %cst_13 = arith.constant 0.000000e+00 : f32
      %33 = vector.broadcast %cst_13 : f32 to vector<1x128xf32>
      %c0_14 = arith.constant 0 : index
      %c0_15 = arith.constant 0 : index
      %34 = vector.load %arg4[%c0_14, %c0_15] : memref<1x128xf32, #tpu.memory_space<vmem>>, vector<1x128xf32>
      tpu.vector_store %arg4[%c0_14, %c0_15], %33 {strides = array<i32>} : memref<1x128xf32, #tpu.memory_space<vmem>>, vector<1x128xf32>,
    } else {
    }
    %c0 = arith.constant 0 : index
    %c0_1 = arith.constant 0 : index
    %3 = vector.load %arg1[%c0, %c0_1] : memref<1x128xf32, #tpu.memory_space<vmem>>, vector<1x128xf32>
    %c0_2 = arith.constant 0 : index
    %c0_3 = arith.constant 0 : index
    %4 = vector.load %arg2[%c0_2, %c0_3] : memref<1x128xf32, #tpu.memory_space<vmem>>, vector<1x128xf32>
    %cst = arith.constant 0.000000e+00 : f32
    %5 = vector.broadcast %cst : f32 to vector<1x128xf32>
    %6 = arith.subf %5, %3 : vector<1x128xf32>
    %cst_4 = arith.constant 0.000000e+00 : f32
    %7 = vector.broadcast %cst_4 : f32 to vector<1x128xf32>
    %8 = arith.maximumf %6, %7 : vector<1x128xf32>
    %9 = math.absf %3 : vector<1x128xf32>
    %cst_5 = arith.constant 0.000000e+00 : f32
    %10 = vector.broadcast %cst_5 : f32 to vector<1x128xf32>
    %11 = arith.subf %10, %9 : vector<1x128xf32>
    %12 = math.exp %11 : vector<1x128xf32>
    %13 = math.log1p %12 : vector<1x128xf32>
    %14 = arith.addf %8, %13 : vector<1x128xf32>
    %cst_6 = arith.constant 0.000000e+00 : f32
    %15 = vector.broadcast %cst_6 : f32 to vector<1x128xf32>
    %16 = arith.maximumf %4, %15 : vector<1x128xf32>
    %17 = arith.addf %14, %16 : vector<1x128xf32>
    %18 = math.absf %4 : vector<1x128xf32>
    %cst_7 = arith.constant 0.000000e+00 : f32
    %19 = vector.broadcast %cst_7 : f32 to vector<1x128xf32>
    %20 = arith.subf %19, %18 : vector<1x128xf32>
    %21 = math.exp %20 : vector<1x128xf32>
    %22 = math.log1p %21 : vector<1x128xf32>
    %23 = arith.addf %17, %22 : vector<1x128xf32>
    %c0_i32_8 = arith.constant 0 : i32
    %24 = arith.cmpi eq, %arg0, %c0_i32_8 : i32
    %true = arith.constant true
    %25 = arith.xori %24, %true : i1
    %26 = arith.extui %25 : i1 to i32
    %c0_i32_9 = arith.constant 0 : i32
    %27 = arith.cmpi ne, %26, %c0_i32_9 : i32
    scf.if %27 {
      %c0_13 = arith.constant 0 : index
      %c0_14 = arith.constant 0 : index
      %33 = vector.load %arg4[%c0_13, %c0_14] : memref<1x128xf32, #tpu.memory_space<vmem>>, vector<1x128xf32>
      %cst_15 = arith.constant dense<0.000000e+00> : vector<128xf32>
      %34 = vector.multi_reduction <add>, %23, %cst_15 [0] : vector<1x128xf32> to vector<128xf32>
      %35 = vector.shape_cast %34 : vector<128xf32> to vector<1x128xf32>
      %36 = arith.addf %33, %35 : vector<1x128xf32>
      %c0_16 = arith.constant 0 : index
      %c0_17 = arith.constant 0 : index
      %37 = vector.load %arg4[%c0_16, %c0_17] : memref<1x128xf32, #tpu.memory_space<vmem>>, vector<1x128xf32>
      tpu.vector_store %arg4[%c0_16, %c0_17], %36 {strides = array<i32>} : memref<1x128xf32, #tpu.memory_space<vmem>>, vector<1x128xf32>,
    } else {
    }
    %28 = arith.extui %24 : i1 to i32
    %c0_i32_10 = arith.constant 0 : i32
    %29 = arith.cmpi ne, %28, %c0_i32_10 : i32
    scf.if %29 {
      %33 = tpu.iota {dimensions = array<i32: 0>} : vector<1x128xi32>
      %34 = tpu.iota {dimensions = array<i32: 1>} : vector<1x128xi32>
      %c1_i32 = arith.constant 1 : i32
      %35 = arith.muli %arg0, %c1_i32 : i32
      %36 = vector.broadcast %35 : i32 to vector<1x128xi32>
      %37 = arith.addi %36, %33 : vector<1x128xi32>
      %c128_i32 = arith.constant 128 : i32
      %38 = vector.broadcast %c128_i32 : i32 to vector<1x128xi32>
      %39 = arith.muli %37, %38 : vector<1x128xi32>
      %40 = arith.addi %39, %34 : vector<1x128xi32>
      %c0_13 = arith.constant 0 : index
      %c0_14 = arith.constant 0 : index
      %41 = vector.load %arg4[%c0_13, %c0_14] : memref<1x128xf32, #tpu.memory_space<vmem>>, vector<1x128xf32>
      %c8_i32 = arith.constant 8 : i32
      %42 = vector.broadcast %c8_i32 : i32 to vector<1x128xi32>
      %43 = arith.cmpi slt, %40, %42 : vector<1x128xi32>
      %cst_15 = arith.constant 0.000000e+00 : f32
      %44 = vector.broadcast %cst_15 : f32 to vector<1x128xf32>
      %45 = arith.select %43, %23, %44 : vector<1x128xi1>, vector<1x128xf32>
      %cst_16 = arith.constant dense<0.000000e+00> : vector<128xf32>
      %46 = vector.multi_reduction <add>, %45, %cst_16 [0] : vector<1x128xf32> to vector<128xf32>
      %47 = vector.shape_cast %46 : vector<128xf32> to vector<1x128xf32>
      %48 = arith.addf %41, %47 : vector<1x128xf32>
      %c0_17 = arith.constant 0 : index
      %c0_18 = arith.constant 0 : index
      %49 = vector.load %arg4[%c0_17, %c0_18] : memref<1x128xf32, #tpu.memory_space<vmem>>, vector<1x128xf32>
      tpu.vector_store %arg4[%c0_17, %c0_18], %48 {strides = array<i32>} : memref<1x128xf32, #tpu.memory_space<vmem>>, vector<1x128xf32>,
    } else {
    }
    %c0_i32_11 = arith.constant 0 : i32
    %30 = arith.cmpi eq, %arg0, %c0_i32_11 : i32
    %31 = arith.extui %30 : i1 to i32
    %c0_i32_12 = arith.constant 0 : i32
    %32 = arith.cmpi ne, %31, %c0_i32_12 : i32
    scf.if %32 {
      %c0_13 = arith.constant 0 : index
      %c0_14 = arith.constant 0 : index
      %33 = vector.load %arg4[%c0_13, %c0_14] : memref<1x128xf32, #tpu.memory_space<vmem>>, vector<1x128xf32>
      %34 = vector.shape_cast %33 : vector<1x128xf32> to vector<1x1x128xf32>
      %cst_15 = arith.constant dense<0.000000e+00> : vector<1xf32>
      %35 = vector.multi_reduction <add>, %34, %cst_15 [1, 2] : vector<1x1x128xf32> to vector<1xf32>
      %36 = vector.shape_cast %35 : vector<1xf32> to vector<1x1x1xf32>
      %37 = vector.extract %36[0, 0, 0] : f32 from vector<1x1x1xf32>
      %cst_16 = arith.constant 1.250000e-01 : f32
      %38 = arith.mulf %37, %cst_16 : f32
      %39 = vector.broadcast %38 : f32 to vector<1x1xf32>
      %c0_17 = arith.constant 0 : index
      %c0_18 = arith.constant 0 : index
      %40 = vector.load %arg3[%c0_17, %c0_18] : memref<1x1xf32, #tpu.memory_space<vmem>>, vector<1x1xf32>
      tpu.vector_store %arg3[%c0_17, %c0_18], %39 {strides = array<i32>} : memref<1x1xf32, #tpu.memory_space<vmem>>, vector<1x1xf32>,
    } else {
    }
    return
  }
  func.func @transform_0(%arg0: i32) -> (i32, i32) {
    %c0_i32 = arith.constant 0 : i32
    %c0_i32_0 = arith.constant 0 : i32
    return %arg0, %c0_i32 : i32, i32
  }
  func.func @transform_1(%arg0: i32) -> (i32, i32) {
    %c0_i32 = arith.constant 0 : i32
    %c0_i32_0 = arith.constant 0 : i32
    return %arg0, %c0_i32 : i32, i32
  }
  func.func @transform_2(%arg0: i32) -> (i32, i32) {
    %c0_i32 = arith.constant 0 : i32
    %c0_i32_0 = arith.constant 0 : i32
    %c0_i32_1 = arith.constant 0 : i32
    return %c0_i32, %c0_i32_0 : i32, i32
  }
}

</mosaic_0001>

<bundles_post_ra>
// kernel: tpu_custom_call.1
= control target key start
LH: loop header
LB: loop body
LE: loop exit
PB: predicated region body
PF: predicated region fallthrough
CT: control target
= control target key end

     0   :  { %7 = vsyncpa [#allocation4], 0  ;;  %s225_s0 = inlined_call_operand.hbm [shape: f32[1,128], index: 0, kind: input, shape index: {}]   ;;  %s226_s1 = inlined_call_operand.vmem [shape: f32[1,128], index: 1, kind: input, shape index: {}]   ;;  %s227_s2 = inlined_call_operand.hbm [shape: f32[1,1], index: 2, kind: output, shape index: {}]  }
   0x1   :  { %8 = vsyncpa [#allocation5], 0  ;;  %s180_s9 = smov [#allocation3]   ;;  %s132_s13 = scalar_lea.hbm %s225_s0, 16 }
   0x2   :  { %s15_s10 = sshll.u32 %s180_s9, 4  ;;  %p133_p0 = scmp.ne.s32.totalorder %s225_s0, %s132_s13  ;;  %s16_s10 = int_to_ptr.vmem [resolvable:$true] %s15_s10 }
   0x3   :  { %p136_p1 = scmp.lt.u32.totalorder %s132_s13, %s225_s0 }
   0x5   :  { %p138_p2 = pnand %p136_p1, %p133_p0 }
   0x7   :  { %141 = shalt.err (!%p138_p2)
}
   0x8   :  { %s142_s18 = scalar_lea.vmem %s16_s10, 16  ;;  %s146_s19 = scalar_lea.vmem %s16_s10, 32 }
   0x9   :  { %p143_p3 = scmp.ne.s32.totalorder %s16_s10, %s142_s18  ;;  %p147_p4 = scmp.lt.s32.totalorder %s16_s10, %s16_s10 }
   0xa   :  { %p148_p5 = scmp.lt.s32.totalorder %s146_s19, %s142_s18 }
   0xc   :  { %p149_p6 = por %p148_p5, %p147_p4 }
   0xe   :  { %p150_p7 = pnand %p149_p6, %p143_p3 }
  0x10   :  { %153 = shalt.err (!%p150_p7)
}
  0x11   :  { %18 = dma.hbm_to_vmem [thread:$0]  %s225_s0, 16, %s16_s10, [#allocation4]  }
  0x12   :  { %176 = dma.done.wait [#allocation4], 16  }
  0x13   :  { %177 = vsyncadd [#allocation4], 4294967280  ;;  %v181_v0 = vmov 0.0   ;;  %v29_v1 = vld [vmem:[#allocation3] sm:$0x1]  ;;  %v74_v14 = vlaneseq  ;;  %vm89_vm3 = vcmask 1040384  }
  0x14   :  { %28 = vst [vmem:[#allocation2] sm:$0x1] %v181_v0  ;;  %v30_v2 = vld [vmem:[%s226_s1] sm:$0x1]  ;;  %v33_v3 = vand.u32 2147483647, %v29_v1 }
  0x15   :  { %v49_v4 = vand.u32 2147483647, %v30_v2  ;;  %v75_v17 = vshrl.u32 %v74_v14, 7  ;;  %v31_v18 = vsub.f32 0.0, %v29_v1  ;;  %v77_v23 = vand.u32 127, %v74_v14  ;;  %s182_s0 = smov [#allocation6]  }
  0x16   :  { %v34_v5 = vsub.f32 0.0, %v33_v3  ;;  %v47_v30 = vmax.f32 %v30_v2, 0.0  ;;  %s110_s1 = sshll.u32 %s182_s0, 4  ;;  %vm102_vm4 = vcmask 0   ;;  %s111_s1 = int_to_ptr.vmem [resolvable:$true] %s110_s1 }
  0x17   :  { %v50_v6 = vsub.f32 0.0, %v49_v4  ;;  %v80_v24 = vmul.u32 128, %v75_v17  ;;  %v32_v26 = vmax.f32 %v31_v18, 0.0  ;;  %s154_s26 = scalar_lea.vmem %s111_s1, 16  ;;  %s158_s27 = scalar_lea.vmem %s111_s1, 32 }
  0x18   :  { %v35_v7 = vmul.f32 1.442695, %v34_v5  ;;  %p155_p8 = scmp.ne.s32.totalorder %s111_s1, %s154_s26  ;;  %p159_p9 = scmp.lt.s32.totalorder %s111_s1, %s111_s1 }
  0x19   :  { %v51_v8 = vmul.f32 1.442695, %v50_v6  ;;  %v81_v33 = vadd.s32 %v80_v24, %v77_v23  ;;  %p160_p10 = scmp.lt.s32.totalorder %s158_s27, %s154_s26 }
  0x1a   :  { %124 = vpow2.f32 %v35_v7 }
  0x1b   :  { %126 = vpow2.f32 %v51_v8  ;;  %vm83_vm2 = vcmp.lt.s32.totalorder %v81_v33, 8  ;;  %v82_v38 = vld [vmem:[#allocation2] sm:$0x1]  ;;  %p161_p11 = por %p160_p10, %p159_p9 }
  0x1d   :  { %p162_p12 = pnand %p161_p11, %p155_p8 }
  0x24   :  { %v125_v9 = vpop.eup %124 }
  0x25   :  { %v127_v10 = vpop.eup %126  ;;  %v37_v11 = vadd.f32 1.0, %v125_v9  ;;  %v40_v13 = vmul.f32 -0.5, %v125_v9  ;;  %v43_v19 = vand.u32 2147483647, %v125_v9 }
  0x26   :  { %v53_v12 = vadd.f32 1.0, %v127_v10  ;;  %v56_v15 = vmul.f32 -0.5, %v127_v10  ;;  %v59_v21 = vand.u32 2147483647, %v127_v10 }
  0x27   :  { %128 = vlog2.f32 %v37_v11  ;;  %v41_v16 = vadd.f32 1.0, %v40_v13  ;;  %vm44_vm0 = vcmp.lt.f32.partialorder %v43_v19, 0.0004427343 }
  0x28   :  { %130 = vlog2.f32 %v53_v12  ;;  %v57_v20 = vadd.f32 1.0, %v56_v15  ;;  %vm60_vm1 = vcmp.lt.f32.partialorder %v59_v21, 0.0004427343 }
  0x29   :  { %v42_v22 = vmul.f32 %v125_v9, %v41_v16 }
  0x2a   :  { %v58_v29 = vmul.f32 %v127_v10, %v57_v20 }
  0x31   :  { %v129_v25 = vpop.eup %128 }
  0x32   :  { %v131_v27 = vpop.eup %130  ;;  %v39_v28 = vmul.f32 0.6931472, %v129_v25 }
  0x33   :  { %v55_v31 = vmul.f32 0.6931472, %v131_v27 }
  0x34   :  { %v45_v32 = vsel %vm44_vm0, %v42_v22, %v39_v28 }
  0x35   :  { %v46_v34 = vadd.f32 %v45_v32, %v32_v26  ;;  %v61_v35 = vsel %vm60_vm1, %v58_v29, %v55_v31 }
  0x37   :  { %v48_v36 = vadd.f32 %v47_v30, %v46_v34 }
  0x39   :  { %v62_v37 = vadd.f32 %v61_v35, %v48_v36 }
  0x3b   :  { %v84_v39 = vsel %vm83_vm2, %v62_v37, 0.0 }
  0x3c   :  { %v86_v40 = vadd.f32 %v84_v39, %v82_v38 }
  0x3e   :  { %87 = vst [vmem:[#allocation2] sm:$0x1] %v86_v40 }
  0x45   :  { %v88_v41 = vld [vmem:[#allocation2] sm:$0x1] }
  0x46   :  { %v90_v42 = vsel %vm89_vm3, %v88_v41, 0.0 }
  0x47   :  { %91 = vadd.xlane.f32.xlu0 %v90_v42 }
  0xd4   :  { %v92_v43 = vpop.xlane.xlu0 %91 }
  0xd5   :  { %v93_v44 = vrot.slane %v92_v43, 4 }
  0xd7   :  { %v94_v45 = vadd.f32 %v93_v44, %v92_v43 }
  0xd9   :  { %v95_v46 = vrot.slane %v94_v45, 2 }
  0xdb   :  { %v96_v47 = vadd.f32 %v95_v46, %v94_v45 }
  0xdd   :  { %v97_v48 = vrot.slane %v96_v47, 1 }
  0xdf   :  { %v98_v49 = vadd.f32 %v97_v48, %v96_v47 }
  0xe1   :  { %119 = vpush %v98_v49 }
 0x112   :  { %s120_s24 = spop %119 }
 0x113   :  { %s100_s25 = smul.f32 0.125, %s120_s24 }
 0x115   :  { %v101_v50 = vstv %s100_s25 }
 0x116   :  { %103 = vst.msk [vmem:[#allocation6] sm:$0x1] %vm102_vm4, %v101_v50 }
 0x117   :  { %165 = shalt.err (!%p162_p12)
}
 0x118   :  { %s166_s30 = scalar_lea.hbm %s227_s2, 16 }
 0x119   :  { %p167_p13 = scmp.ne.s32.totalorder %s227_s2, %s166_s30  ;;  %p170_p0 = scmp.lt.u32.totalorder %s166_s30, %s227_s2 }
 0x11b   :  { %p172_p1 = pnand %p170_p0, %p167_p13 }
 0x11d   :  { %175 = shalt.err (!%p172_p1)
}
 0x11e   :  { %113 = dma.vmem_to_hbm [thread:$0]  %s111_s1, 16, %s227_s2, [#allocation5]  }
 0x11f   :  { %178 = dma.done.wait [#allocation5], 16  }
 0x120   :  { %179 = vsyncadd [#allocation5], 4294967280 }
 0x121   :  { %117 = vsyncpa [#allocation4], 1 }
 0x122   :  { %118 = vsyncpa [#allocation5], 1 }

</bundles_post_ra>
